<compile_context>
chip_gen: v5e
topology: v5e:2x2
jax: 0.10.0
libtpu: 0.0.40
codegen_flags: <defaults>
</compile_context>

<pallas_src>
import math

import jax
import jax.numpy as jnp
from jax.experimental import pallas as pl
from jax.experimental.pallas import tpu as pltpu


# ---------------------------------------------------------------------------
# Kernels
# ---------------------------------------------------------------------------
def _augment_flat_kernel(x_ref, o_ref):
    """Lane-dense path. x_ref: (TB, C*HW), o_ref: (TB, C_out*HW)."""
    n_copy = x_ref.shape[1]
    # Copy original features into the leading columns (unmasked full-width vst
    # when n_copy % 128 == 0), then zero-fill the augmented tail.
    o_ref[:, :n_copy] = x_ref[...]
    o_ref[:, n_copy:] = jnp.zeros(
        (o_ref.shape[0], o_ref.shape[1] - n_copy), o_ref.dtype
    )


def _augment_3d_kernel(x_ref, o_ref):
    """Fallback when the flattened feature row is not 128-aligned.
    x_ref: (TB, C, HW), o_ref: (TB, C_out, HW). Block last dims equal the full
    array dims, so the (8,128) BlockSpec constraint is satisfied."""
    C = x_ref.shape[1]
    o_ref[:, :C, :] = x_ref[...]
    o_ref[:, C:, :] = jnp.zeros(
        (o_ref.shape[0], o_ref.shape[1] - C, o_ref.shape[2]), o_ref.dtype
    )


# ---------------------------------------------------------------------------
# Tiling / VMEM heuristics
# ---------------------------------------------------------------------------
_BLOCK_BUDGET = 16 << 20   # single-buffer (in + out) bytes per block
_SPLIT_MIN = 1 << 20       # only force >= 2 grid steps above this total size


def _pick_batch_tile(B: int, bytes_per_row: int, itemsize: int) -> int:
    """Batch tile:
      * whole problem in one grid step when tiny (per-step overhead dominates,
        and a forced megacore split never pays off below ~1 MiB),
      * otherwise the largest tile under the VMEM budget that leaves >= 2 grid
        steps (v7x megacore) and is a sublane multiple so vregs stay packed."""
    total = B * bytes_per_row
    if B == 1 or total <= min(_SPLIT_MIN, _BLOCK_BUDGET):
        return B
    sublane = max(1, 32 // itemsize)  # 8 (f32), 16 (bf16), 32 (int8)
    tb = min(max(_BLOCK_BUDGET // bytes_per_row, 1), (B + 1) // 2)
    if tb >= sublane:
        tb = (tb // sublane) * sublane
    return max(int(tb), 1)


def _vmem_limit_bytes(block_bytes: int) -> int:
    """Generation-aware scoped-VMEM limit: double-buffered (in+out) footprint
    plus headroom, capped at 3/4 of physical VMEM (128 MiB v5e/v6e, 64 MiB v7x)."""
    phys = 64 << 20
    try:
        info = pltpu.get_tpu_info()
        phys = int(getattr(info, "vmem_capacity_bytes", phys)) or phys
    except Exception:
        pass
    needed = 2 * block_bytes + (2 << 20)
    return int(min(max(needed, 8 << 20), (phys * 3) // 4))


# ---------------------------------------------------------------------------
# Wrapper
# ---------------------------------------------------------------------------
def augmenter(x: jax.Array, augment_dims: int = 5, augment_idx: int = 1) -> jax.Array:
    """out = concat([x, zeros], axis=1) — torchdyn Augmenter's default forward."""
    # TODO(synk): only the default (augment_func=None -> zero padding) path and
    # augment_idx == 1 are implemented; an arbitrary augment_func nn.Module has
    # no single Pallas equivalent.
    assert augment_idx == 1, "this kernel implements channel-axis (idx=1) augmentation"
    assert x.ndim >= 2

    B, C = x.shape[0], x.shape[1]
    rest = tuple(x.shape[2:])
    HW = int(math.prod(rest)) if rest else 1
    C_out = C + augment_dims

    itemsize = jnp.dtype(x.dtype).itemsize
    bytes_per_row = (C + C_out) * HW * itemsize
    TB = _pick_batch_tile(B, bytes_per_row, itemsize)
    grid = (pl.cdiv(B, TB),)
    cparams = pltpu.CompilerParams(
        dimension_semantics=("parallel",),
        vmem_limit_bytes=_vmem_limit_bytes(TB * bytes_per_row),
    )

    if (C * HW) % 128 == 0:
        # Lane-dense layout: flatten all feature dims into the lane axis.
        x_in = x.reshape(B, C * HW)
        out_flat = pl.pallas_call(
            _augment_flat_kernel,
            out_shape=jax.ShapeDtypeStruct((B, C_out * HW), x.dtype),
            grid=grid,
            in_specs=[pl.BlockSpec((TB, C * HW), lambda b: (b, 0))],
            out_specs=pl.BlockSpec((TB, C_out * HW), lambda b: (b, 0)),
            compiler_params=cparams,
        )(x_in)
        return out_flat.reshape((B, C_out) + rest)

    # Fallback: channels on sublanes, spatial flattened on lanes.
    x_in = x.reshape(B, C, HW)
    out3 = pl.pallas_call(
        _augment_3d_kernel,
        out_shape=jax.ShapeDtypeStruct((B, C_out, HW), x.dtype),
        grid=grid,
        in_specs=[pl.BlockSpec((TB, C, HW), lambda b: (b, 0, 0))],
        out_specs=pl.BlockSpec((TB, C_out, HW), lambda b: (b, 0, 0)),
        compiler_params=cparams,
    )(x_in)
    return out3.reshape((B, C_out) + rest)


if __name__ == "__main__":
    key = jax.random.PRNGKey(0)
    B, C, H, W = 2, 4, 16, 16
    augment_dims = 5

    x = jax.random.normal(key, (B, C, H, W), dtype=jnp.float32)

    out = augmenter(x, augment_dims=augment_dims, augment_idx=1)
    out = jax.block_until_ready(out)

    # Reference (pure JAX) check of the torch semantics.
    ref = jnp.concatenate(
        [x, jnp.zeros((B, augment_dims, H, W), dtype=x.dtype)], axis=1
    )
    assert out.shape == (B, C + augment_dims, H, W), out.shape
    assert out.dtype == x.dtype
    assert jnp.allclose(out, ref), "mismatch vs reference"

    print("KERNEL_OK")
</pallas_src>

<mosaic_0001>
module attributes {stable_mosaic.version = 11 : i64} {
  func.func @_augment_flat_kernel(%arg0: i32, %arg1: memref<2x1024xf32, #tpu.memory_space<vmem>>, %arg2: memref<2x2304xf32, #tpu.memory_space<vmem>>) attributes {dimension_semantics = [#tpu.dimension_semantics<parallel>], iteration_bounds = array<i64: 1>, scalar_prefetch = 0 : i64, scratch_operands = 0 : i64, tpu.core_type = #tpu.core_type<tc>, window_params = [{transform_indices = @transform_0, window_bounds = array<i64: 2, 1024>}, {transform_indices = @transform_1, window_bounds = array<i64: 2, 2304>}]} {
    %c0 = arith.constant 0 : index
    %c0_0 = arith.constant 0 : index
    %0 = vector.load %arg1[%c0, %c0_0] : memref<2x1024xf32, #tpu.memory_space<vmem>>, vector<2x1024xf32>
    %c0_1 = arith.constant 0 : index
    %c0_2 = arith.constant 0 : index
    %1 = vector.load %arg2[%c0_1, %c0_2] : memref<2x2304xf32, #tpu.memory_space<vmem>>, vector<2x1024xf32>
    tpu.vector_store %arg2[%c0_1, %c0_2], %0 {strides = array<i32>} : memref<2x2304xf32, #tpu.memory_space<vmem>>, vector<2x1024xf32>,
    %cst = arith.constant 0.000000e+00 : f32
    %2 = vector.broadcast %cst : f32 to vector<2x1280xf32>
    %c0_3 = arith.constant 0 : index
    %c1024 = arith.constant 1024 : index
    %3 = vector.load %arg2[%c0_3, %c1024] : memref<2x2304xf32, #tpu.memory_space<vmem>>, vector<2x1280xf32>
    tpu.vector_store %arg2[%c0_3, %c1024], %2 {strides = array<i32>} : memref<2x2304xf32, #tpu.memory_space<vmem>>, vector<2x1280xf32>,
    return
  }
  func.func @transform_0(%arg0: i32) -> (i32, i32) {
    %c0_i32 = arith.constant 0 : i32
    %c0_i32_0 = arith.constant 0 : i32
    return %arg0, %c0_i32 : i32, i32
  }
  func.func @transform_1(%arg0: i32) -> (i32, i32) {
    %c0_i32 = arith.constant 0 : i32
    %c0_i32_0 = arith.constant 0 : i32
    return %arg0, %c0_i32 : i32, i32
  }
}

</mosaic_0001>

<bundles_post_ra>
// kernel: tpu_custom_call.1
= control target key start
LH: loop header
LB: loop body
LE: loop exit
PB: predicated region body
PF: predicated region fallthrough
CT: control target
= control target key end

     0   :  { %6 = vsyncpa [#allocation3], 0  ;;  %s121_s0 = inlined_call_operand.hbm [shape: f32[2,1024], index: 0, kind: input, shape index: {}]   ;;  %s122_s1 = inlined_call_operand.hbm [shape: f32[2,2304], index: 1, kind: output, shape index: {}]  }
   0x1   :  { %7 = vsyncpa [#allocation4], 0  ;;  %s13_s8 = sshll.u32 %s121_s0, 4  ;;  %s102_s9 = smov [#allocation2]   ;;  %s14_s8 = int_to_ptr.hbm [resolvable:$true] %s13_s8 }
   0x2   :  { %s15_s10 = sshll.u32 %s102_s9, 4  ;;  %s16_s10 = int_to_ptr.vmem [resolvable:$true] %s15_s10 }
   0x3   :  { %18 = dma.hbm_to_vmem [thread:$0]  %s14_s8, 256, %s16_s10, [#allocation3]  }
   0x4   :  { %98 = dma.done.wait [#allocation3], 256  }
   0x5   :  { %99 = vsyncadd [#allocation3], 4294967040  ;;  %v103_v0 = vmov 0.0   ;;  %s104_s11 = smov [#allocation5]   ;;  %s37_s15 = sshll.u32 %s122_s1, 4  ;;  %v23_v1 = vld [vmem:[#allocation2] sm:$0xff]  ;;  %s38_s15 = int_to_ptr.hbm [resolvable:$true] %s37_s15 }
   0x6   :  { %27 = vst [vmem:[#allocation5 + $0x10] sm:$0xff] %v103_v0  ;;  %s35_s12 = sshll.u32 %s104_s11, 4  ;;  %v24_v2 = vld [vmem:[#allocation2 + $0x8] sm:$0xff]  ;;  %s36_s12 = int_to_ptr.vmem [resolvable:$true] %s35_s12 }
   0x7   :  { %28 = vst [vmem:[#allocation5 + $0x18] sm:$0xff] %v103_v0 }
   0x8   :  { %29 = vst [vmem:[#allocation5 + $0x20] sm:$0xf] %v103_v0 }
   0x9   :  { %25 = vst [vmem:[#allocation5] sm:$0xff] %v23_v1 }
   0xa   :  { %26 = vst [vmem:[#allocation5 + $0x8] sm:$0xff] %v24_v2 }
   0xb   :  { %40 = dma.vmem_to_hbm [thread:$0]  %s36_s12, 576, %s38_s15, [#allocation4]  }
   0xc   :  { %100 = dma.done.wait [#allocation4], 576  }
   0xd   :  { %101 = vsyncadd [#allocation4], 4294966720 }
   0xe   :  { %45 = vsyncpa [#allocation3], 1 }
   0xf   :  { %46 = vsyncpa [#allocation4], 1 }

</bundles_post_ra>
